<compile_context>
chip_gen: v7x
topology: tpu7x:2x2x1
jax: 0.10.0
libtpu: 0.0.40
codegen_flags: <defaults>
</compile_context>

<pallas_src>
import functools

import jax
import jax.numpy as jnp
from jax.experimental import pallas as pl
from jax.experimental.pallas import tpu as pltpu


# ----------------------------------------------------------------------------
# Pallas kernel: batched, K-tiled GradCAM reduction
# ----------------------------------------------------------------------------
def _gradcam_kernel(act_ref, grad_ref, cam_ref, acc_ref, *, inv_hw,
                    channels_on_lanes):
    # act_ref/grad_ref : one (TB, TK, HW) or (TB, HW, TK) K-chunk in VMEM
    # cam_ref          : (TB, HW) f32 output block (resident across K axis)
    # acc_ref          : (TB, HW) f32 VMEM accumulator scratch
    k_idx = pl.program_id(1)

    @pl.when(k_idx == 0)
    def _init():
        acc_ref[...] = jnp.zeros_like(acc_ref)

    # Upcast only this chunk (no full-block f32 temporaries).  relu(A) matches
    # the PyTorch reference for any hooked layer; it is a free VPU pass here.
    A = jnp.maximum(act_ref[...].astype(jnp.float32), 0.0)
    G = grad_ref[...].astype(jnp.float32)

    if channels_on_lanes:
        # blocks are (TB, HW, TK): K on lanes, HW on sublanes.
        a_k = jnp.sum(G, axis=1) * inv_hw                       # (TB, TK)
        acc_ref[...] += jnp.sum(a_k[:, None, :] * A, axis=2)    # (TB, HW)
    else:
        # blocks are (TB, TK, HW): HW on lanes, K on sublanes.
        a_k = jnp.sum(G, axis=2) * inv_hw                       # (TB, TK)
        acc_ref[...] += jnp.sum(a_k[:, :, None] * A, axis=1)    # (TB, HW)

    @pl.when(k_idx == pl.num_programs(1) - 1)
    def _finalize():
        cam_ref[...] = jnp.maximum(acc_ref[...], 0.0)


def _pick_batch_tile(B):
    # Amortize per-grid-step overhead with up to 8-row blocks, but keep >= 2
    # grid steps when B allows so both v7x TensorCores get work.
    if B > 8:
        return 8
    if B > 2 and B % 2 == 0:
        return B // 2
    return B


def _pick_k_tile(K, TB, HW, itemsize, align, input_budget_bytes):
    # Pipelined input buffers per step: 2 inputs x 2 buffers x TB*TK*HW*itemsize.
    max_tk = max(1, input_budget_bytes // (4 * TB * HW * itemsize))
    if K <= max_tk:
        return K
    tk = (max_tk // align) * align
    while tk >= align:
        if K % tk == 0:
            return tk
        tk -= align
    return K  # no clean aligned divisor; fall back to full K (vmem limit follows)


def gradcam_pallas(activations, gradients):
    """activations, gradients: (B, K, H, W) -> cam_relu (B, H, W) float32.

    Inputs are streamed in their native dtype (no wrapper-side convert); all
    accumulation happens in f32 inside the kernel.
    """
    B, K, H, W = activations.shape
    HW = H * W
    itemsize = jnp.dtype(activations.dtype).itemsize

    # Layout: keep lanes dense.  Toy/typical 16x16 (HW % 128 == 0) keeps HW on
    # lanes; small-HW production maps (7x7 etc.) with K % 128 == 0 put K on
    # lanes instead to avoid ~2.6x lane-padding of every tile.
    channels_on_lanes = (HW % 128 != 0) and (K % 128 == 0)

    a_flat = activations.reshape(B, K, HW)
    g_flat = gradients.reshape(B, K, HW)
    if channels_on_lanes:
        # TODO(synk): ideally the producer emits NHWC so this transpose fuses
        # into the producing op instead of being a separate HBM pass.
        a_flat = jnp.transpose(a_flat, (0, 2, 1))   # (B, HW, K)
        g_flat = jnp.transpose(g_flat, (0, 2, 1))

    TB = _pick_batch_tile(B)
    # ~8 MiB of pipelined input buffers per step fits v5e's 16 MiB default
    # scoped VMEM and leaves ample headroom on v7x's 64 MiB physical.
    TK = _pick_k_tile(K, TB, HW, itemsize,
                      align=(128 if channels_on_lanes else 8),
                      input_budget_bytes=8 * 1024 * 1024)

    grid = (pl.cdiv(B, TB), pl.cdiv(K, TK))

    if channels_on_lanes:
        block = (TB, HW, TK)
        idx_map = lambda b, k: (b, 0, k)
    else:
        block = (TB, TK, HW)
        idx_map = lambda b, k: (b, k, 0)

    # Explicit VMEM limit derived from the actual blocks (raises v5e's 16 MiB
    # default scoped limit when needed; stays well under v7x's 64 MiB).
    in_bytes = 4 * TB * TK * HW * itemsize           # 2 inputs x 2 buffers
    out_bytes = 2 * TB * HW * 4                      # double-buffered f32 out
    acc_bytes = TB * HW * 4                          # accumulator scratch
    needed = in_bytes + out_bytes + acc_bytes
    vmem_limit = int(min(48 * 2**20, max(32 * 2**20, 2 * needed)))

    kernel = functools.partial(_gradcam_kernel, inv_hw=1.0 / HW,
                               channels_on_lanes=channels_on_lanes)

    cost = pl.CostEstimate(
        flops=3 * B * K * HW,
        transcendentals=0,
        bytes_accessed=2 * B * K * HW * itemsize + B * HW * 4,
    )

    cam = pl.pallas_call(
        kernel,
        out_shape=jax.ShapeDtypeStruct((B, HW), jnp.float32),
        grid_spec=pltpu.PrefetchScalarGridSpec(
            num_scalar_prefetch=0,
            grid=grid,
            in_specs=[
                pl.BlockSpec(block, idx_map),
                pl.BlockSpec(block, idx_map),
            ],
            out_specs=pl.BlockSpec((TB, HW), lambda b, k: (b, 0)),
            scratch_shapes=[pltpu.VMEM((TB, HW), jnp.float32)],
        ),
        compiler_params=pltpu.CompilerParams(
            dimension_semantics=("parallel", "arbitrary"),
            vmem_limit_bytes=vmem_limit,
        ),
        cost_estimate=cost,
    )(a_flat, g_flat)

    return cam.reshape(B, H, W)


# ----------------------------------------------------------------------------
# Synthetic model (plain JAX glue): 1x1-conv -> [hooked ReLU layer] -> GAP -> FC
# The "hooked layer" is the ReLU: forward_result = relu(pre_act),
# backward_result = d(loss)/d(pre_act)  (gradient w.r.t. the hooked layer
# input, matching the PyTorch forward_hook / register_hook semantics).
# ----------------------------------------------------------------------------
def make_params(key, c_in, k_feat, n_classes):
    k1, k2, k3 = jax.random.split(key, 3)
    W1 = jax.random.normal(k1, (k_feat, c_in), dtype=jnp.float32) * 0.1
    b1 = jax.random.normal(k2, (k_feat,), dtype=jnp.float32) * 0.1
    W2 = jax.random.normal(k3, (n_classes, k_feat), dtype=jnp.float32) * 0.1
    return W1, b1, W2


def gradcam_forward(image_batch, W1, b1, W2):
    """Replicates GradCAM.forward semantics. image_batch: (B, C, H, W) NCHW."""
    pre_act = jnp.einsum('kc,bchw->bkhw', W1, image_batch) + b1[None, :, None, None]

    def loss_fn(pre_a):
        A = jnp.maximum(pre_a, 0.0)                    # hooked layer output
        pooled = jnp.mean(A, axis=(2, 3))              # (B, K)
        logits = pooled @ W2.T                         # (B, N)
        preds = jnp.argmax(logits, axis=1)             # per-sample argmax
        # loss = sum_b logits[b, pred_b] (indices constant, as in torch.max)
        loss = jnp.sum(jnp.take_along_axis(
            logits, jax.lax.stop_gradient(preds)[:, None], axis=1))
        return loss, (A, preds)

    (_, (A, preds)), G = jax.value_and_grad(loss_fn, has_aux=True)(pre_act)

    cam_relu = gradcam_pallas(A, G)

    # In the PyTorch loop, `pred` leaks the value from the *last* batch index.
    pred = preds[-1]
    return cam_relu, pred


if __name__ == "__main__":
    key = jax.random.PRNGKey(0)
    kx, kp, kl = jax.random.split(key, 3)

    B, C_in, H, W = 2, 4, 16, 16
    K_feat, N_cls = 8, 10

    image_batch = jax.random.normal(kx, (B, C_in, H, W), dtype=jnp.float32)
    label_batch = jax.random.randint(kl, (B,), 0, N_cls)   # only its length is used
    W1, b1, W2 = make_params(kp, C_in, K_feat, N_cls)

    cam_relu, pred = gradcam_forward(image_batch, W1, b1, W2)
    jax.block_until_ready((cam_relu, pred))

    # ------------------------------------------------------------------
    # reference check in plain JAX (full f32 -- kernel now streams f32)
    # ------------------------------------------------------------------
    pre_act = jnp.einsum('kc,bchw->bkhw', W1, image_batch) + b1[None, :, None, None]
    A_ref = jnp.maximum(pre_act, 0.0)
    pooled = jnp.mean(A_ref, axis=(2, 3))
    logits = pooled @ W2.T
    preds_ref = jnp.argmax(logits, axis=1)
    G_ref = jax.grad(lambda p: jnp.sum(jnp.take_along_axis(
        (jnp.mean(jnp.maximum(p, 0.0), axis=(2, 3)) @ W2.T),
        preds_ref[:, None], axis=1)))(pre_act)

    a_k_ref = jnp.mean(G_ref, axis=(2, 3), keepdims=True)
    cam_ref = jnp.maximum(
        jnp.sum(a_k_ref * jnp.maximum(A_ref, 0.0), axis=1), 0.0)

    assert cam_relu.shape == (B, H, W)
    assert jnp.allclose(cam_relu, cam_ref, atol=1e-5, rtol=1e-4)
    assert int(pred) == int(preds_ref[-1])

    print("KERNEL_OK")
</pallas_src>

<mosaic_0001>
module attributes {stable_mosaic.version = 11 : i64} {
  func.func @_gradcam_kernel(%arg0: i32, %arg1: i32, %arg2: memref<2x8x256xf32, #tpu.memory_space<vmem>>, %arg3: memref<2x8x256xf32, #tpu.memory_space<vmem>>, %arg4: memref<2x256xf32, #tpu.memory_space<vmem>>, %arg5: memref<2x256xf32, #tpu.memory_space<vmem>>) attributes {dimension_semantics = [#tpu.dimension_semantics<parallel>, #tpu.dimension_semantics<arbitrary>], iteration_bounds = array<i64: 1, 1>, scalar_prefetch = 0 : i64, scratch_operands = 1 : i64, tpu.core_type = #tpu.core_type<tc>, window_params = [{transform_indices = @transform_0, window_bounds = array<i64: 2, 8, 256>}, {transform_indices = @transform_1, window_bounds = array<i64: 2, 8, 256>}, {transform_indices = @transform_2, window_bounds = array<i64: 2, 256>}]} {
    %c0_i32 = arith.constant 0 : i32
    %0 = arith.cmpi eq, %arg1, %c0_i32 : i32
    %1 = arith.extui %0 : i1 to i32
    %c0_i32_0 = arith.constant 0 : i32
    %2 = arith.cmpi ne, %1, %c0_i32_0 : i32
    scf.if %2 {
      %cst_15 = arith.constant 0.000000e+00 : f32
      %20 = vector.broadcast %cst_15 : f32 to vector<2x256xf32>
      %c0_16 = arith.constant 0 : index
      %c0_17 = arith.constant 0 : index
      %21 = vector.load %arg5[%c0_16, %c0_17] : memref<2x256xf32, #tpu.memory_space<vmem>>, vector<2x256xf32>
      tpu.vector_store %arg5[%c0_16, %c0_17], %20 {strides = array<i32>} : memref<2x256xf32, #tpu.memory_space<vmem>>, vector<2x256xf32>,
    } else {
    }
    %c0 = arith.constant 0 : index
    %c0_1 = arith.constant 0 : index
    %c0_2 = arith.constant 0 : index
    %3 = vector.load %arg2[%c0, %c0_1, %c0_2] : memref<2x8x256xf32, #tpu.memory_space<vmem>>, vector<2x8x256xf32>
    %cst = arith.constant 0.000000e+00 : f32
    %4 = vector.broadcast %cst : f32 to vector<2x8x256xf32>
    %5 = arith.maximumf %3, %4 : vector<2x8x256xf32>
    %c0_3 = arith.constant 0 : index
    %c0_4 = arith.constant 0 : index
    %c0_5 = arith.constant 0 : index
    %6 = vector.load %arg3[%c0_3, %c0_4, %c0_5] : memref<2x8x256xf32, #tpu.memory_space<vmem>>, vector<2x8x256xf32>
    %cst_6 = arith.constant dense<0.000000e+00> : vector<2x8xf32>
    %7 = vector.multi_reduction <add>, %6, %cst_6 [2] : vector<2x8x256xf32> to vector<2x8xf32>
    %cst_7 = arith.constant 3.906250e-03 : f32
    %8 = vector.broadcast %cst_7 : f32 to vector<2x8xf32>
    %9 = arith.mulf %7, %8 : vector<2x8xf32>
    %c0_8 = arith.constant 0 : index
    %c0_9 = arith.constant 0 : index
    %10 = vector.load %arg5[%c0_8, %c0_9] : memref<2x256xf32, #tpu.memory_space<vmem>>, vector<2x256xf32>
    %11 = vector.shape_cast %9 : vector<2x8xf32> to vector<2x8x1xf32>
    %12 = vector.broadcast %11 : vector<2x8x1xf32> to vector<2x8x256xf32>
    %13 = arith.mulf %12, %5 : vector<2x8x256xf32>
    %cst_10 = arith.constant dense<0.000000e+00> : vector<2x256xf32>
    %14 = vector.multi_reduction <add>, %13, %cst_10 [1] : vector<2x8x256xf32> to vector<2x256xf32>
    %15 = arith.addf %10, %14 : vector<2x256xf32>
    %c0_11 = arith.constant 0 : index
    %c0_12 = arith.constant 0 : index
    %16 = vector.load %arg5[%c0_11, %c0_12] : memref<2x256xf32, #tpu.memory_space<vmem>>, vector<2x256xf32>
    tpu.vector_store %arg5[%c0_11, %c0_12], %15 {strides = array<i32>} : memref<2x256xf32, #tpu.memory_space<vmem>>, vector<2x256xf32>,
    %c0_i32_13 = arith.constant 0 : i32
    %17 = arith.cmpi eq, %arg1, %c0_i32_13 : i32
    %18 = arith.extui %17 : i1 to i32
    %c0_i32_14 = arith.constant 0 : i32
    %19 = arith.cmpi ne, %18, %c0_i32_14 : i32
    scf.if %19 {
      %c0_15 = arith.constant 0 : index
      %c0_16 = arith.constant 0 : index
      %20 = vector.load %arg5[%c0_15, %c0_16] : memref<2x256xf32, #tpu.memory_space<vmem>>, vector<2x256xf32>
      %cst_17 = arith.constant 0.000000e+00 : f32
      %21 = vector.broadcast %cst_17 : f32 to vector<2x256xf32>
      %22 = arith.maximumf %20, %21 : vector<2x256xf32>
      %c0_18 = arith.constant 0 : index
      %c0_19 = arith.constant 0 : index
      %23 = vector.load %arg4[%c0_18, %c0_19] : memref<2x256xf32, #tpu.memory_space<vmem>>, vector<2x256xf32>
      tpu.vector_store %arg4[%c0_18, %c0_19], %22 {strides = array<i32>} : memref<2x256xf32, #tpu.memory_space<vmem>>, vector<2x256xf32>,
    } else {
    }
    return
  }
  func.func @transform_0(%arg0: i32, %arg1: i32) -> (i32, i32, i32) {
    %c0_i32 = arith.constant 0 : i32
    %c0_i32_0 = arith.constant 0 : i32
    return %arg0, %arg1, %c0_i32 : i32, i32, i32
  }
  func.func @transform_1(%arg0: i32, %arg1: i32) -> (i32, i32, i32) {
    %c0_i32 = arith.constant 0 : i32
    %c0_i32_0 = arith.constant 0 : i32
    return %arg0, %arg1, %c0_i32 : i32, i32, i32
  }
  func.func @transform_2(%arg0: i32, %arg1: i32) -> (i32, i32) {
    %c0_i32 = arith.constant 0 : i32
    %c0_i32_0 = arith.constant 0 : i32
    return %arg0, %c0_i32 : i32, i32
  }
}

</mosaic_0001>

<bundles_post_ra>
// kernel: tpu_custom_call.1
= control target key start
LH: loop header
LB: loop body
LE: loop exit
PB: predicated region body
PF: predicated region fallthrough
CT: control target
= control target key end

     0   :  { %7 = vsyncpa [#allocation4], 0  ;;  %s289_s0 = inlined_call_operand.hbm [shape: f32[2,8,256], index: 0, kind: input, shape index: {}]   ;;  %s290_s1 = inlined_call_operand.hbm [shape: f32[2,8,256], index: 1, kind: input, shape index: {}]   ;;  %s291_s2 = inlined_call_operand.hbm [shape: f32[2,256], index: 2, kind: output, shape index: {}]  }
   0x1   :  { %8 = vsyncpa [#allocation7], 0 }
   0x2   :  { %9 = vsyncpa [#allocation5], 0  ;;  %s231_s9 = smov [#allocation3]   ;;  %s159_s13 = scalar_lea.hbm %s289_s0, 512 }
   0x3   :  { %s15_s10 = sshll.u32 %s231_s9, 4  ;;  %p160_p0 = scmp.ne.s32.totalorder %s289_s0, %s159_s13  ;;  %s16_s10 = int_to_ptr.vmem [resolvable:$true] %s15_s10 }
   0x4   :  { %p163_p1 = scmp.lt.u32.totalorder %s159_s13, %s289_s0 }
   0x6   :  { %p165_p2 = pnand %p163_p1, %p160_p0 }
   0x8   :  { %168 = shalt.err (!%p165_p2)
}
   0x9   :  { %s169_s18 = scalar_lea.vmem %s16_s10, 512  ;;  %p174_p4 = scmp.lt.s32.totalorder %s16_s10, %s16_s10 }
   0xa   :  { %p170_p3 = scmp.ne.s32.totalorder %s16_s10, %s169_s18  ;;  %p175_p5 = scmp.lt.s32.totalorder %s169_s18, %s169_s18 }
   0xc   :  { %p176_p6 = por %p175_p5, %p174_p4 }
   0xe   :  { %p177_p7 = pnand %p176_p6, %p170_p3 }
  0x10   :  { %180 = shalt.err (!%p177_p7)
}
  0x11   :  { %s232_s19 = smov 256   ;;  %s233_s20 = smov 16  }
  0x12   :  { %21 = dma.hbm_to_vmem [thread:$0]  %s289_s0, 512, %s16_s10, [#allocation4], %s232_s19, %s232_s19, %s233_s20  }
  0x13   :  { %s234_s23 = smov [#allocation6]   ;;  %s181_s27 = scalar_lea.hbm %s290_s1, 512 }
  0x14   :  { %s27_s24 = sshll.u32 %s234_s23, 4  ;;  %p182_p8 = scmp.ne.s32.totalorder %s290_s1, %s181_s27  ;;  %s28_s24 = int_to_ptr.vmem [resolvable:$true] %s27_s24 }
  0x15   :  { %p185_p9 = scmp.lt.u32.totalorder %s181_s27, %s290_s1 }
  0x17   :  { %p187_p10 = pnand %p185_p9, %p182_p8 }
  0x19   :  { %190 = shalt.err (!%p187_p10)
}
  0x1a   :  { %s191_s4 = scalar_lea.vmem %s28_s24, 512  ;;  %p196_p12 = scmp.lt.s32.totalorder %s28_s24, %s28_s24 }
  0x1b   :  { %p192_p11 = scmp.ne.s32.totalorder %s28_s24, %s191_s4  ;;  %p197_p13 = scmp.lt.s32.totalorder %s191_s4, %s191_s4 }
  0x1d   :  { %p198_p0 = por %p197_p13, %p196_p12 }
  0x1f   :  { %p199_p1 = pnand %p198_p0, %p192_p11 }
  0x21   :  { %202 = shalt.err (!%p199_p1)
}
  0x22   :  { %33 = dma.hbm_to_vmem [thread:$0]  %s290_s1, 512, %s28_s24, [#allocation7], %s232_s19, %s232_s19, %s233_s20  }
  0x23   :  { %225 = dma.done.wait [#allocation4], 512  }
  0x24   :  { %226 = vsyncadd [#allocation4], 4294966784 }
  0x25   :  { %227 = dma.done.wait [#allocation7], 512  }
  0x26   :  { %228 = vsyncadd [#allocation7], 4294966784  ;;  %v55_v0 = vld [vmem:[#allocation6 + $0x10] sm:$0xff]  ;;  %v56_v1 = vld [vmem:[#allocation6 + $0x18] sm:$0xff]  ;;  %v235_v6 = vmov 0.0   ;;  %v102_v25 = vlaneseq  ;;  %vm119_vm0 = vcmask 1041409  }
  0x27   :  { %v53_v2 = vld [vmem:[#allocation6] sm:$0xff]  ;;  %v60_v3 = vadd.f32 %v56_v1, %v55_v0  ;;  %v54_v4 = vld [vmem:[#allocation6 + $0x8] sm:$0xff]  ;;  %44 = vst [vmem:[#allocation2] sm:$0xf] %v235_v6  ;;  %v47_v7 = vld [vmem:[#allocation3 + $0x10] sm:$0xff]  ;;  %vm121_vm1 = vcmask 1043459  }
  0x28   :  { %v57_v5 = vadd.f32 %v54_v4, %v53_v2  ;;  %v48_v8 = vld [vmem:[#allocation3 + $0x18] sm:$0xff]  ;;  %v51_v9 = vmax.f32 %v47_v7, 0.0  ;;  %v45_v12 = vld [vmem:[#allocation3] sm:$0xff]  ;;  %v46_v13 = vld [vmem:[#allocation3 + $0x8] sm:$0xff]  ;;  %v236_v23 = vmov 1983009808  }
  0x29   :  { %61 = vadd.xlane.f32.xlu0 %v60_v3  ;;  %v52_v10 = vmax.f32 %v48_v8, 0.0  ;;  %v49_v17 = vmax.f32 %v45_v12, 0.0  ;;  %v50_v18 = vmax.f32 %v46_v13, 0.0  ;;  %v100_v24 = vunpack.c.l.s4 %v236_v23  ;;  %s237_s1 = smov [#allocation8]  }
  0x2a   :  { %v103_v35 = vshrl.u32 %v102_v25, 7  ;;  %vm123_vm2 = vcmask 1045509   ;;  %vm125_vm3 = vcmask 1047559   ;;  %s142_s6 = sshll.u32 %s237_s1, 4  ;;  %s143_s6 = int_to_ptr.vmem [resolvable:$true] %s142_s6 }
  0x2b   :  { %v101_v34 = vunpack.c.0.s8 %v100_v24  ;;  %s203_s7 = scalar_lea.vmem %s143_s6, 64  ;;  %p208_p3 = scmp.lt.s32.totalorder %s143_s6, %s143_s6 }
  0x2c   :  { %p204_p2 = scmp.ne.s32.totalorder %s143_s6, %s203_s7  ;;  %p209_p4 = scmp.lt.s32.totalorder %s203_s7, %s203_s7 }
  0x2d   :  { %58 = vadd.xlane.f32.xlu0 %v57_v5  ;;  %v104_v44 = vsub.s32 %v101_v34, %v103_v35 }
  0x2e   :  { %v65_v59 = vld [vmem:[#allocation2] sm:$0xf]  ;;  %p210_p5 = por %p209_p4, %p208_p3 }
  0x30   :  { %p211_p6 = pnand %p210_p5, %p204_p2 }
  0xb6   :  { %v62_v11 = vpop.xlane.xlu0 %61 }
  0xb7   :  { %v64_v14 = vmul.f32 0.00390625, %v62_v11 }
  0xb9   :  { %v68_v15 = vmul.f32 %v64_v14, %v51_v9  ;;  %v69_v16 = vmul.f32 %v64_v14, %v52_v10 }
  0xba   :  { %v59_v19 = vpop.xlane.xlu0 %58 }
  0xbb   :  { %v82_v20 = vrot.slane %v68_v15, 4  ;;  %v88_v21 = vrot.slane %v69_v16, 4  ;;  %v63_v22 = vmul.f32 0.00390625, %v59_v19 }
  0xbd   :  { %v83_v26 = vadd.f32 %v82_v20, %v68_v15  ;;  %v89_v27 = vadd.f32 %v88_v21, %v69_v16  ;;  %v66_v28 = vmul.f32 %v63_v22, %v49_v17  ;;  %v67_v29 = vmul.f32 %v63_v22, %v50_v18 }
  0xbf   :  { %v84_v30 = vrot.slane %v83_v26, 2  ;;  %v90_v31 = vrot.slane %v89_v27, 2  ;;  %v70_v32 = vrot.slane %v66_v28, 4  ;;  %v76_v33 = vrot.slane %v67_v29, 4 }
  0xc1   :  { %v85_v36 = vadd.f32 %v84_v30, %v83_v26  ;;  %v91_v37 = vadd.f32 %v90_v31, %v89_v27  ;;  %v71_v38 = vadd.f32 %v70_v32, %v66_v28  ;;  %v77_v39 = vadd.f32 %v76_v33, %v67_v29 }
  0xc3   :  { %v86_v40 = vrot.slane %v85_v36, 1  ;;  %v92_v41 = vrot.slane %v91_v37, 1  ;;  %v72_v42 = vrot.slane %v71_v38, 2  ;;  %v78_v43 = vrot.slane %v77_v39, 2 }
  0xc5   :  { %v87_v45 = vadd.f32 %v86_v40, %v85_v36  ;;  %v93_v46 = vadd.f32 %v92_v41, %v91_v37  ;;  %v73_v47 = vadd.f32 %v72_v42, %v71_v38  ;;  %v79_v48 = vadd.f32 %v78_v43, %v77_v39 }
  0xc7   :  { %v106_v49 = vcombine.low %v87_v45, %v93_v46  ;;  %v74_v50 = vrot.slane %v73_v47, 1  ;;  %v80_v51 = vrot.slane %v79_v48, 1 }
  0xc9   :  { %v113_v52 = vrot.slane %v106_v49, %v104_v44  ;;  %v75_v53 = vadd.f32 %v74_v50, %v73_v47  ;;  %v81_v54 = vadd.f32 %v80_v51, %v79_v48 }
  0xcb   :  { %v98_v55 = vcombine.low %v75_v53, %v81_v54  ;;  %v118_v56 = vrot.slane %v113_v52, 7 }
  0xcd   :  { %v105_v57 = vrot.slane %v98_v55, %v104_v44 }
  0xcf   :  { %v120_v58 = vsel %vm119_vm0, %v118_v56, %v105_v57 }
  0xd0   :  { %v122_v60 = vsel %vm121_vm1, %v118_v56, %v120_v58 }
  0xd1   :  { %v124_v61 = vsel %vm123_vm2, %v118_v56, %v122_v60 }
  0xd2   :  { %v126_v62 = vsel %vm125_vm3, %v118_v56, %v124_v61 }
  0xd3   :  { %v128_v63 = vadd.f32 %v126_v62, %v65_v59 }
  0xd5   :  { %129 = vst [vmem:[#allocation2] sm:$0xf] %v128_v63 }
  0xdc   :  { %v133_v0 = vld [vmem:[#allocation2] sm:$0xf] }
  0xdd   :  { %v134_v1 = vmax.f32 %v133_v0, 0.0 }
  0xdf   :  { %135 = vst [vmem:[#allocation8] sm:$0xf] %v134_v1 }
  0xe0   :  { %214 = shalt.err (!%p211_p6)
}
  0xe1   :  { %s215_s10 = scalar_lea.hbm %s291_s2, 64 }
  0xe2   :  { %p216_p7 = scmp.ne.s32.totalorder %s291_s2, %s215_s10  ;;  %p219_p8 = scmp.lt.u32.totalorder %s215_s10, %s291_s2 }
  0xe4   :  { %p221_p9 = pnand %p219_p8, %p216_p7 }
  0xe6   :  { %224 = shalt.err (!%p221_p9)
}
  0xe7   :  { %145 = dma.vmem_to_hbm [thread:$0]  %s143_s6, 64, %s291_s2, [#allocation5]  }
  0xe8   :  { %229 = dma.done.wait [#allocation5], 64  }
  0xe9   :  { %230 = vsyncadd [#allocation5], 4294967232 }
  0xea   :  { %149 = vsyncpa [#allocation4], 1 }
  0xeb   :  { %150 = vsyncpa [#allocation7], 1 }
  0xec   :  { %151 = vsyncpa [#allocation5], 1 }

</bundles_post_ra>
